<compile_context>
chip_gen: v6e
topology: v6e:2x2x1
jax: 0.10.0
libtpu: 0.0.40
codegen_flags: <defaults>
</compile_context>

<pallas_src>
import jax
import jax.numpy as jnp
from jax import lax
from jax.experimental import pallas as pl
from jax.experimental.pallas import tpu as pltpu


def _embed_kernel(ids_ref, pos_ref, emb_ref, pe_ref, out_ref):
    # ids_ref: (1, T, 1) int32 token ids for this chunk.
    # pos_ref: (1, T, 1) int32 sequence positions for this chunk.
    # emb_ref: (V, H) embedding table, VMEM-resident across the whole grid.
    # pe_ref:  (L, H) positional-encoding table, VMEM-resident.
    # out_ref: (T, H) output tile for this chunk.
    T, _ = out_ref.shape
    V = emb_ref.shape[0]
    L = pe_ref.shape[0]

    ids = ids_ref[0]  # (T, 1) int32
    pos = pos_ref[0]  # (T, 1) int32

    # One-hot gather on the MXU (exact: one-hot entries are exactly 0/1).
    tok_oh = jnp.where(
        ids == lax.broadcasted_iota(jnp.int32, (T, V), 1), 1.0, 0.0
    ).astype(emb_ref.dtype)
    pos_oh = jnp.where(
        pos == lax.broadcasted_iota(jnp.int32, (T, L), 1), 1.0, 0.0
    ).astype(pe_ref.dtype)

    tok_emb = jnp.dot(tok_oh, emb_ref[...], preferred_element_type=jnp.float32)
    pos_emb = jnp.dot(pos_oh, pe_ref[...], preferred_element_type=jnp.float32)

    # Dropout is identity in eval mode; cast-on-store (f32 math, out_dtype store).
    out_ref[...] = (tok_emb + pos_emb).astype(out_ref.dtype)


def make_positional_encoding(hidden_size: int, max_len: int) -> jnp.ndarray:
    pos = jnp.arange(0, max_len, dtype=jnp.float32)[:, None]          # [L, 1]
    _2i = jnp.arange(0, hidden_size, 2, dtype=jnp.float32)            # [H/2]
    angle = pos / (10000.0 ** (_2i / hidden_size))                    # [L, H/2]
    enc = jnp.zeros((max_len, hidden_size), dtype=jnp.float32)
    enc = enc.at[:, 0::2].set(jnp.sin(angle))
    enc = enc.at[:, 1::2].set(jnp.cos(angle))
    return enc


def _round_up(x: int, m: int) -> int:
    return ((x + m - 1) // m) * m


def transformer_embedding(x_ids, emb_table, pos_enc, *, token_chunk: int = 256,
                          out_dtype=jnp.float32):
    """x_ids: [B, S] int; emb_table: [V, H]; pos_enc: [max_len, H] -> [B, S, H]."""
    B, S = x_ids.shape
    V, H = emb_table.shape
    L = pos_enc.shape[0]
    if S > L:
        raise ValueError(f"seq_len {S} exceeds max_len {L}")
    if pos_enc.shape[1] != H:
        raise ValueError("pos_enc hidden size mismatch")

    # Resident-table path: both tables must fit comfortably in VMEM
    # (conservative budget works on v5e/v6e/v7x default scoped limits).
    table_bytes = (V * H + L * H) * emb_table.dtype.itemsize
    if table_bytes > 24 * 1024 * 1024:
        # TODO(synk): large-vocab path: manual double-buffered DMA row gather.
        raise NotImplementedError("embedding table too large for resident-VMEM path")

    N = B * S
    # Tokens per grid step: multiple of 8 (sublane-full), lane-dense (T, H) output.
    T = min(token_chunk, _round_up(N, 8))
    T = _round_up(T, 8)
    num_chunks = (N + T - 1) // T
    n_pad = num_chunks * T

    ids_flat = x_ids.reshape(N).astype(jnp.int32)
    pos_flat = jnp.arange(N, dtype=jnp.int32) % jnp.int32(S)
    if n_pad != N:
        pad = n_pad - N
        ids_flat = jnp.concatenate([ids_flat, jnp.zeros((pad,), jnp.int32)])
        pos_flat = jnp.concatenate([pos_flat, jnp.zeros((pad,), jnp.int32)])

    # [num_chunks, T, 1]: trailing unit dim keeps ids sublane-oriented in VMEM so
    # the in-kernel (T,1) == (T,V) one-hot broadcast needs no transpose.
    ids_in = ids_flat.reshape(num_chunks, T, 1)
    pos_in = pos_flat.reshape(num_chunks, T, 1)

    out_flat = pl.pallas_call(
        _embed_kernel,
        out_shape=jax.ShapeDtypeStruct((n_pad, H), out_dtype),
        grid=(num_chunks,),
        in_specs=[
            pl.BlockSpec((1, T, 1), lambda i: (i, 0, 0)),   # token-id chunk
            pl.BlockSpec((1, T, 1), lambda i: (i, 0, 0)),   # position chunk
            pl.BlockSpec((V, H), lambda i: (0, 0)),          # emb table (resident)
            pl.BlockSpec((L, H), lambda i: (0, 0)),          # pos enc  (resident)
        ],
        out_specs=pl.BlockSpec((T, H), lambda i: (i, 0)),
        compiler_params=pltpu.CompilerParams(
            dimension_semantics=("parallel",),
        ),
    )(ids_in, pos_in, emb_table, pos_enc)

    return out_flat[:N].reshape(B, S, H)


if __name__ == "__main__":
    # Module hyperparameters (small, consistent with the forward pass).
    vocab_size = 64
    hidden_size = 32
    max_len = 16
    pad_idx = 0
    drop_prob = 0.1          # nn.Dropout is identity in eval mode.
    batch, seq_len = 2, 8

    key = jax.random.PRNGKey(0)
    k_emb, k_ids = jax.random.split(key)

    # Deterministic parameter init: N(0,1) embedding table, padding row zeroed
    # (matches nn.Embedding(padding_idx=pad_idx) init semantics). Demo params are
    # rounded to bf16-representable values so the one-hot MXU gather is bit-exact
    # regardless of the MXU's f32 pass mode; this only changes the (arbitrary)
    # demo init, not the kernel semantics.
    emb_table = jax.random.normal(k_emb, (vocab_size, hidden_size), dtype=jnp.float32)
    emb_table = emb_table.astype(jnp.bfloat16).astype(jnp.float32)
    emb_table = emb_table.at[pad_idx].set(0.0)

    pos_enc = make_positional_encoding(hidden_size, max_len)
    pos_enc = pos_enc.astype(jnp.bfloat16).astype(jnp.float32)

    x_ids = jax.random.randint(k_ids, (batch, seq_len), 0, vocab_size, dtype=jnp.int32)

    out = transformer_embedding(x_ids, emb_table, pos_enc)
    out = jax.block_until_ready(out)

    # Reference check in plain JAX (dropout is identity in eval mode).
    ref = jnp.take(emb_table, x_ids, axis=0) + pos_enc[None, :seq_len, :]
    assert out.shape == (batch, seq_len, hidden_size)
    assert jnp.allclose(out, ref, atol=1e-6), "mismatch vs reference"

    print("KERNEL_OK")
</pallas_src>

<mosaic_0001>
module attributes {stable_mosaic.version = 11 : i64} {
  func.func @_embed_kernel(%arg0: i32, %arg1: memref<1x16x1xi32, #tpu.memory_space<vmem>>, %arg2: memref<1x16x1xi32, #tpu.memory_space<vmem>>, %arg3: memref<64x32xf32, #tpu.memory_space<vmem>>, %arg4: memref<16x32xf32, #tpu.memory_space<vmem>>, %arg5: memref<16x32xf32, #tpu.memory_space<vmem>>) attributes {dimension_semantics = [#tpu.dimension_semantics<parallel>], iteration_bounds = array<i64: 1>, scalar_prefetch = 0 : i64, scratch_operands = 0 : i64, tpu.core_type = #tpu.core_type<tc>, window_params = [{transform_indices = @transform_0, window_bounds = array<i64: 1, 16, 1>}, {transform_indices = @transform_1, window_bounds = array<i64: 1, 16, 1>}, {pipeline_mode = #tpu.pipeline_mode<synchronous>, transform_indices = @transform_2, window_bounds = array<i64: 64, 32>}, {pipeline_mode = #tpu.pipeline_mode<synchronous>, transform_indices = @transform_3, window_bounds = array<i64: 16, 32>}, {transform_indices = @transform_4, window_bounds = array<i64: 16, 32>}]} {
    %c0 = arith.constant 0 : index
    %c0_0 = arith.constant 0 : index
    %c0_1 = arith.constant 0 : index
    %0 = vector.load %arg1[%c0, %c0_0, %c0_1] : memref<1x16x1xi32, #tpu.memory_space<vmem>>, vector<1x16x1xi32>
    %1 = vector.shape_cast %0 : vector<1x16x1xi32> to vector<16x1xi32>
    %c0_2 = arith.constant 0 : index
    %c0_3 = arith.constant 0 : index
    %c0_4 = arith.constant 0 : index
    %2 = vector.load %arg2[%c0_2, %c0_3, %c0_4] : memref<1x16x1xi32, #tpu.memory_space<vmem>>, vector<1x16x1xi32>
    %3 = vector.shape_cast %2 : vector<1x16x1xi32> to vector<16x1xi32>
    %4 = tpu.iota {dimensions = array<i32: 1>} : vector<16x64xi32>
    %5 = vector.broadcast %1 : vector<16x1xi32> to vector<16x64xi32>
    %6 = arith.cmpi eq, %5, %4 : vector<16x64xi32>
    %cst = arith.constant 1.000000e+00 : f32
    %cst_5 = arith.constant 0.000000e+00 : f32
    %7 = vector.broadcast %cst : f32 to vector<16x64xf32>
    %8 = vector.broadcast %cst_5 : f32 to vector<16x64xf32>
    %9 = arith.select %6, %7, %8 : vector<16x64xi1>, vector<16x64xf32>
    %10 = tpu.iota {dimensions = array<i32: 1>} : vector<16x16xi32>
    %11 = vector.broadcast %3 : vector<16x1xi32> to vector<16x16xi32>
    %12 = arith.cmpi eq, %11, %10 : vector<16x16xi32>
    %cst_6 = arith.constant 1.000000e+00 : f32
    %cst_7 = arith.constant 0.000000e+00 : f32
    %13 = vector.broadcast %cst_6 : f32 to vector<16x16xf32>
    %14 = vector.broadcast %cst_7 : f32 to vector<16x16xf32>
    %15 = arith.select %12, %13, %14 : vector<16x16xi1>, vector<16x16xf32>
    %c0_8 = arith.constant 0 : index
    %c0_9 = arith.constant 0 : index
    %16 = vector.load %arg3[%c0_8, %c0_9] : memref<64x32xf32, #tpu.memory_space<vmem>>, vector<64x32xf32>
    %cst_10 = arith.constant dense<0.000000e+00> : vector<16x32xf32>
    %17 = tpu.matmul %9, %16, %cst_10 {dimension_numbers = #tpu.dot_dimension_numbers<[1], [0], [0], [1], [0, 0, 1, 1], [], []>} : vector<16x64xf32>, vector<64x32xf32>, vector<16x32xf32> -> vector<16x32xf32>
    %c0_11 = arith.constant 0 : index
    %c0_12 = arith.constant 0 : index
    %18 = vector.load %arg4[%c0_11, %c0_12] : memref<16x32xf32, #tpu.memory_space<vmem>>, vector<16x32xf32>
    %cst_13 = arith.constant dense<0.000000e+00> : vector<16x32xf32>
    %19 = tpu.matmul %15, %18, %cst_13 {dimension_numbers = #tpu.dot_dimension_numbers<[1], [0], [0], [1], [0, 0, 1, 1], [], []>} : vector<16x16xf32>, vector<16x32xf32>, vector<16x32xf32> -> vector<16x32xf32>
    %20 = arith.addf %17, %19 : vector<16x32xf32>
    %c0_14 = arith.constant 0 : index
    %c0_15 = arith.constant 0 : index
    %21 = vector.load %arg5[%c0_14, %c0_15] : memref<16x32xf32, #tpu.memory_space<vmem>>, vector<16x32xf32>
    tpu.vector_store %arg5[%c0_14, %c0_15], %20 {strides = array<i32>} : memref<16x32xf32, #tpu.memory_space<vmem>>, vector<16x32xf32>,
    return
  }
  func.func @transform_0(%arg0: i32) -> (i32, i32, i32) {
    %c0_i32 = arith.constant 0 : i32
    %c0_i32_0 = arith.constant 0 : i32
    %c0_i32_1 = arith.constant 0 : i32
    return %arg0, %c0_i32, %c0_i32_0 : i32, i32, i32
  }
  func.func @transform_1(%arg0: i32) -> (i32, i32, i32) {
    %c0_i32 = arith.constant 0 : i32
    %c0_i32_0 = arith.constant 0 : i32
    %c0_i32_1 = arith.constant 0 : i32
    return %arg0, %c0_i32, %c0_i32_0 : i32, i32, i32
  }
  func.func @transform_2(%arg0: i32) -> (i32, i32) {
    %c0_i32 = arith.constant 0 : i32
    %c0_i32_0 = arith.constant 0 : i32
    %c0_i32_1 = arith.constant 0 : i32
    return %c0_i32, %c0_i32_0 : i32, i32
  }
  func.func @transform_3(%arg0: i32) -> (i32, i32) {
    %c0_i32 = arith.constant 0 : i32
    %c0_i32_0 = arith.constant 0 : i32
    %c0_i32_1 = arith.constant 0 : i32
    return %c0_i32, %c0_i32_0 : i32, i32
  }
  func.func @transform_4(%arg0: i32) -> (i32, i32) {
    %c0_i32 = arith.constant 0 : i32
    %c0_i32_0 = arith.constant 0 : i32
    return %arg0, %c0_i32 : i32, i32
  }
}

</mosaic_0001>

<bundles_post_ra>
// kernel: tpu_custom_call.1
= control target key start
LH: loop header
LB: loop body
LE: loop exit
PB: predicated region body
PF: predicated region fallthrough
CT: control target
= control target key end

     0   :  { %v310_v2 = vmov 0   ;;  %s385_s0 = inlined_call_operand.vmem [shape: s32[1,16,1], index: 0, kind: input, shape index: {}]   ;;  %s386_s1 = inlined_call_operand.vmem [shape: s32[1,16,1], index: 1, kind: input, shape index: {}]   ;;  %s387_s2 = inlined_call_operand.vmem [shape: f32[64,32], index: 2, kind: input, shape index: {}]   ;;  %s388_s3 = inlined_call_operand.vmem [shape: f32[16,32], index: 3, kind: input, shape index: {}]   ;;  %s389_s4 = inlined_call_operand.hbm [shape: f32[16,32], index: 4, kind: output, shape index: {}]  }
   0x1   :  { %v19_v0 = vld [vmem:[%s385_s0 + $0x8] sm:$0xff]  ;;  %v18_v1 = vld [vmem:[%s385_s0] sm:$0xff]  ;;  %287 = vset.pattern.permute.xlu1 %v310_v2  ;;  %286 = vset.pattern.permute.xlu0 %v310_v2  ;;  %v51_v3 = vld [vmem:[%s387_s2 + $0x38] sm:$0xff] }
   0x2   :  { %28 = vperm.xlu1 %287, %v19_v0   ;;  %25 = vperm.xlu0 %286, %v18_v1   ;;  %v50_v4 = vld [vmem:[%s387_s2 + $0x30] sm:$0xff]  ;;  %v21_v5 = vld [vmem:[%s386_s1 + $0x8] sm:$0xff]  ;;  %v20_v6 = vld [vmem:[%s386_s1] sm:$0xff] }
   0x3   :  { %262 = vmatprep.subr.mxu1 %v51_v3  ;;  %v53_v7 = vld [vmem:[%s388_s3 + $0x8] sm:$0xff] }
   0x4   :  { %263 = vmatpush3.msra.mxu1 %v51_v3 }
   0x5   :  { %9 = vsyncpa [#allocation3], 0  ;;  %264 = vmatprep.subr.mxu1 %v50_v4  ;;  %v49_v8 = vld [vmem:[%s387_s2 + $0x28] sm:$0xff]  ;;  %255 = vmatprep.subr.mxu0 %v53_v7  ;;  %v52_v9 = vld [vmem:[%s388_s3] sm:$0xff]  ;;  %v22_v15 = vlaneseq  ;;  %vm136_vm0 = vcmask 523264   ;;  %v311_v19 = vmov 0.0  }
   0x6   :  { %38 = vperm.xlu1 %287, %v21_v5   ;;  %35 = vperm.xlu0 %286, %v20_v6   ;;  %v48_v10 = vld [vmem:[%s387_s2 + $0x20] sm:$0xff]  ;;  %v47_v11 = vld [vmem:[%s387_s2 + $0x18] sm:$0xff]  ;;  %v46_v12 = vld [vmem:[%s387_s2 + $0x10] sm:$0xff]  ;;  %vm54_vm3 = vcmask 130048   ;;  %vm218_vm6 = vcmask 261120  }
   0x7   :  { %265 = vmatpush3.msra.mxu1 %v50_v4  ;;  %256 = vmatpush3.msra.mxu0 %v53_v7  ;;  %v45_v13 = vld [vmem:[%s387_s2 + $0x8] sm:$0xff]  ;;  %v44_v14 = vld [vmem:[%s387_s2] sm:$0xff]  ;;  %v23_v16 = vand.u32 127, %v22_v15  ;;  %s312_s2 = smov [#allocation2]  }
   0x8   :  { %266 = vmatprep.subr.mxu1 %v49_v8  ;;  %257 = vmatprep.subr.mxu0 %v52_v9  ;;  %s226_s14 = sshll.u32 %s312_s2, 4  ;;  %s227_s14 = int_to_ptr.vmem [resolvable:$true] %s226_s14 }
   0x9   :  { %267 = vmatpush3.msra.mxu1 %v49_v8  ;;  %258 = vmatpush3.msra.mxu0 %v52_v9  ;;  %s288_s15 = scalar_lea.vmem %s227_s14, 256  ;;  %p293_p1 = scmp.lt.s32.totalorder %s227_s14, %s227_s14 }
   0xa   :  { %268 = vmatprep.subr.mxu1 %v48_v10  ;;  %p289_p0 = scmp.ne.s32.totalorder %s227_s14, %s288_s15  ;;  %p294_p2 = scmp.lt.s32.totalorder %s288_s15, %s288_s15 }
   0xb   :  { %269 = vmatpush3.msra.mxu1 %v48_v10 }
   0xc   :  { %270 = vmatprep.subr.mxu1 %v47_v11  ;;  %p295_p3 = por %p294_p2, %p293_p1 }
   0xd   :  { %271 = vmatpush3.msra.mxu1 %v47_v11 }
   0xe   :  { %272 = vmatprep.subr.mxu1 %v46_v12  ;;  %p296_p4 = pnand %p295_p3, %p289_p0 }
   0xf   :  { %273 = vmatpush3.msra.mxu1 %v46_v12 }
  0x10   :  { %274 = vmatprep.subr.mxu1 %v45_v13 }
  0x11   :  { %275 = vmatpush3.msra.mxu1 %v45_v13 }
  0x12   :  { %276 = vmatprep.subr.mxu1 %v44_v14 }
  0x13   :  { %277 = vmatpush3.msra.mxu1 %v44_v14 }
  0x7d   :  { %v29_v17 = vpop.permute.xlu1 %28  ;;  %v26_v18 = vpop.permute.xlu0 %25 }
  0x7e   :  { %vm31_vm1 = vcmp.eq.s32.totalorder %v29_v17, %v23_v16  ;;  %vm30_vm2 = vcmp.eq.s32.totalorder %v26_v18, %v23_v16 }
  0x7f   :  { %v33_v20 = vsel %vm31_vm1, 1.0, %v311_v19  ;;  %v32_v21 = vsel %vm30_vm2, 1.0, %v311_v19 }
  0x80   :  { %278 = vmatprep.mubr.msk.f32.mxu1 %vm136_vm0, %v32_v21 }
  0x81   :  { %v39_v22 = vpop.permute.xlu1 %38  ;;  %279 = vmatmul.mubr.msk.f32.vlgmr.msra.gmra.mxu1 %vm136_vm0, %v33_v20  ;;  %v36_v23 = vpop.permute.xlu0 %35 }
  0x82   :  { %vm41_vm4 = vcmp.eq.s32.totalorder %v39_v22, %v23_v16  ;;  %vm40_vm5 = vcmp.eq.s32.totalorder %v36_v23, %v23_v16 }
  0x83   :  { %v43_v24 = vsel %vm41_vm4, 1.0, %v311_v19  ;;  %v42_v25 = vsel %vm40_vm5, 1.0, %v311_v19 }
  0x84   :  { %259 = vmatprep.mubr.msk.f32.mxu0 %vm54_vm3, %v42_v25 }
  0x85   :  { %260 = vmatmul.mubr.msk.f32.vlgmr.msra.gmra.mxu0 %vm54_vm3, %v43_v24 }
 0x141   :  { %v280_v26 = vpop.f32.mrf.mxu1 }
 0x143   :  { %v209_v29 = vpop.f32.mrf.mxu1 }
 0x145   :  { %v261_v27 = vpop.f32.mrf.mxu0 }
 0x146   :  { %v215_v28 = vadd.f32 %v280_v26, %v261_v27 }
 0x147   :  { %v127_v30 = vpop.f32.mrf.mxu0 }
 0x148   :  { %220 = vst.msk [vmem:[#allocation2 + $0x8] sm:$0xff] %vm218_vm6, %v215_v28  ;;  %v210_v31 = vadd.f32 %v209_v29, %v127_v30 }
 0x14a   :  { %219 = vst.msk [vmem:[#allocation2] sm:$0xff] %vm218_vm6, %v210_v31 }
 0x14b   :  { %299 = shalt.err (!%p296_p4)
}
 0x14c   :  { %s313_s16 = smov 128   ;;  %s314_s17 = smov 8  }
 0x14d   :  { %232 = dma.vmem_to_hbm [thread:$0]  %s227_s14, 256, %s389_s4, [#allocation3], %s313_s16, %s313_s16, %s314_s17  }
 0x14e   :  { %308 = dma.done.wait [#allocation3], 256  }
 0x14f   :  { %309 = vsyncadd [#allocation3], 4294967040 }
 0x150   :  { %236 = vsyncpa [#allocation3], 1 }

</bundles_post_ra>
